<compile_context>
chip_gen: v7x
topology: tpu7x:2x2x1
jax: 0.10.0
libtpu: 0.0.40
codegen_flags: <defaults>
</compile_context>

<pallas_src>
import functools

import jax
import jax.numpy as jnp
from jax.experimental import pallas as pl
from jax.experimental.pallas import tpu as pltpu


# ----------------------------- Pallas kernel ------------------------------- #

def ngcf_fused_kernel(a_ref, x0_ref, w_ref, bias_ref, o_ref, hist_ref, *,
                      num_layers):
    """All NGCF layers in one kernel; grid axis 0 = layer index (sequential)."""
    layer = pl.program_id(0)

    # Step 0: seed the layer history with the initial embedding.
    @pl.when(layer == 0)
    def _():
        hist_ref[0] = x0_ref[...]

    x = hist_ref[layer]                       # (N, D) f32, previous layer output

    # Graph aggregation on the MXU: ax = A @ x  (bf16 operands, f32 accumulate).
    ax = jnp.dot(a_ref[...], x.astype(jnp.bfloat16),
                 preferred_element_type=jnp.float32)

    # Single fused contraction:
    #   ax@W1^T + x@W1^T + (ax*x)@W2^T  ==  [ax + x | ax * x] @ [W1^T ; W2^T]
    lhs = jnp.concatenate([ax + x, ax * x], axis=-1).astype(jnp.bfloat16)
    h = jnp.dot(lhs, w_ref[0], preferred_element_type=jnp.float32)
    h = h + bias_ref[0]                       # bias = rowsum*(b1+b2) + b1 (precomputed)
    h = jnp.where(h > 0.0, h, 0.01 * h)       # F.leaky_relu, default slope 0.01
    hist_ref[layer + 1] = h

    # Last step: emit the concatenated output slab in one lane-dense store.
    @pl.when(layer == num_layers - 1)
    def _():
        o_ref[...] = jnp.concatenate(
            [hist_ref[i] for i in range(num_layers + 1)], axis=-1)


def ngcf_forward_fused(a_bf16, x0, w_stacked, bias_stacked, *, num_layers):
    """One pallas_call for the whole NGCF stack.

    a_bf16:       (N, N)     bf16  normalized dense adjacency
    x0:           (N, D)     f32   initial embeddings
    w_stacked:    (L, 2D, D) bf16  per-layer [W1^T ; W2^T]
    bias_stacked: (L, N, D)  f32   per-layer rowsum*(b1+b2) + b1
    returns:      (N, (L+1)*D) f32 = concat([emb0, emb1, ..., embL], -1)
    """
    N, D = x0.shape
    kernel = functools.partial(ngcf_fused_kernel, num_layers=num_layers)
    return pl.pallas_call(
        kernel,
        out_shape=jax.ShapeDtypeStruct((N, (num_layers + 1) * D), jnp.float32),
        grid_spec=pltpu.PrefetchScalarGridSpec(
            num_scalar_prefetch=0,
            grid=(num_layers,),
            in_specs=[
                pl.BlockSpec((N, N), lambda l: (0, 0)),            # A (resident)
                pl.BlockSpec((N, D), lambda l: (0, 0)),            # emb0 (resident)
                pl.BlockSpec((1, 2 * D, D), lambda l: (l, 0, 0)),  # per-layer weights
                pl.BlockSpec((1, N, D), lambda l: (l, 0, 0)),      # per-layer bias
            ],
            out_specs=pl.BlockSpec((N, (num_layers + 1) * D), lambda l: (0, 0)),
            scratch_shapes=[pltpu.VMEM((num_layers + 1, N, D), jnp.float32)],
        ),
        compiler_params=pltpu.CompilerParams(
            dimension_semantics=("arbitrary",)),   # layers carry state sequentially
    )(a_bf16, x0, w_stacked, bias_stacked)


# ------------------------------ Model glue --------------------------------- #

def build_norm_adjacency(edge_index, num_nodes):
    """degree / symmetric normalization / scatter into a dense adjacency."""
    from_, to_ = edge_index[0], edge_index[1]
    deg = jnp.zeros((num_nodes,), jnp.float32).at[to_].add(1.0)
    deg_inv_sqrt = jnp.where(deg > 0, jax.lax.rsqrt(deg), 0.0)   # inf -> 0
    norm = deg_inv_sqrt[from_] * deg_inv_sqrt[to_]
    A = jnp.zeros((num_nodes, num_nodes), jnp.float32).at[to_, from_].add(norm)
    rowsum = jnp.sum(A, axis=1, keepdims=True)
    return A, rowsum


@functools.partial(jax.jit, static_argnames=("num_nodes",))
def recommender_forward(params, edge_index, num_nodes):
    """Mirrors RecommenderSystem.forward for conv_arch == 'ngcf' (eval mode)."""
    emb0 = params["embedding"]                       # (N, D) f32
    layers = params["layers"]
    num_layers = len(layers)

    A, rowsum = build_norm_adjacency(edge_index, num_nodes)

    # Pre-stack fused per-layer weights and bias terms (done once, outside kernel).
    w_stacked = jnp.stack(
        [jnp.concatenate([lyr["w1"].T, lyr["w2"].T], axis=0) for lyr in layers],
        axis=0).astype(jnp.bfloat16)                 # (L, 2D, D)
    bias_stacked = jnp.stack(
        [rowsum * (lyr["b1"] + lyr["b2"])[None, :] + lyr["b1"][None, :]
         for lyr in layers], axis=0)                 # (L, N, D) f32

    out = ngcf_forward_fused(A.astype(jnp.bfloat16), emb0, w_stacked,
                             bias_stacked, num_layers=num_layers)
    return emb0, out


# --------------------------- Parameter creation ----------------------------- #

def xavier_uniform(key, shape):
    fan_in, fan_out = shape[1], shape[0]
    bound = jnp.sqrt(6.0 / (fan_in + fan_out))
    return jax.random.uniform(key, shape, jnp.float32, -bound, bound)


def init_params(key, num_nodes, latent_dim, num_layers):
    keys = jax.random.split(key, 1 + 4 * num_layers)
    params = {"embedding": xavier_uniform(keys[0], (num_nodes, latent_dim)),
              "layers": []}
    kidx = 1
    lin_bound = 1.0 / jnp.sqrt(latent_dim)
    for _ in range(num_layers):
        w1 = xavier_uniform(keys[kidx], (latent_dim, latent_dim)); kidx += 1
        w2 = xavier_uniform(keys[kidx], (latent_dim, latent_dim)); kidx += 1
        b1 = jax.random.uniform(keys[kidx], (latent_dim,), jnp.float32,
                                -lin_bound, lin_bound); kidx += 1
        b2 = jax.random.uniform(keys[kidx], (latent_dim,), jnp.float32,
                                -lin_bound, lin_bound); kidx += 1
        params["layers"].append({"w1": w1, "b1": b1, "w2": w2, "b2": b2})
    return params


# ------------------------- Pure-JAX reference check ------------------------- #

def reference_forward(params, edge_index, num_nodes):
    """Per-edge scatter-add reference in f32 (mirrors the PyTorch module)."""
    emb0 = params["embedding"]
    from_, to_ = edge_index[0], edge_index[1]
    deg = jnp.zeros((num_nodes,), jnp.float32).at[to_].add(1.0)
    dinv = jnp.where(deg > 0, jax.lax.rsqrt(deg), 0.0)
    norm = dinv[from_] * dinv[to_]

    embs = [emb0]
    emb = emb0
    for layer in params["layers"]:
        w1, b1, w2, b2 = layer["w1"], layer["b1"], layer["w2"], layer["b2"]
        xj, xi = emb[from_], emb[to_]
        msg = norm[:, None] * ((xj @ w1.T + b1) + ((xj * xi) @ w2.T + b2))
        agg = jnp.zeros_like(emb).at[to_].add(msg)
        h = agg + (emb @ w1.T + b1)
        emb = jnp.where(h > 0, h, 0.01 * h)
        embs.append(emb)
    return emb0, jnp.concatenate(embs, axis=-1)


# ----------------------------------- Main ----------------------------------- #

if __name__ == "__main__":
    num_users, num_items = 24, 40
    num_nodes = num_users + num_items        # N = 64
    latent_dim = 32                          # D = 32
    num_layers = 2
    num_interactions = 128

    root = jax.random.PRNGKey(0)
    k_param, k_u, k_i = jax.random.split(root, 3)

    params = init_params(k_param, num_nodes, latent_dim, num_layers)

    # Bipartite user->item interactions, made bidirectional (2 * E directed edges).
    users = jax.random.randint(k_u, (num_interactions,), 0, num_users)
    items = jax.random.randint(k_i, (num_interactions,), num_users, num_nodes)
    edge_index = jnp.stack([
        jnp.concatenate([users, items]),     # from_
        jnp.concatenate([items, users]),     # to_
    ], axis=0).astype(jnp.int32)             # shape (2, 256)

    emb0, out = recommender_forward(params, edge_index, num_nodes)
    jax.block_until_ready(out)

    assert emb0.shape == (num_nodes, latent_dim)
    assert out.shape == (num_nodes, latent_dim * (num_layers + 1))

    # Tolerance loosened vs. pure-f32: matmul operands are bf16 (f32 accumulate).
    emb0_ref, out_ref = reference_forward(params, edge_index, num_nodes)
    max_err = float(jnp.max(jnp.abs(out - out_ref)))
    assert jnp.allclose(out, out_ref, atol=5e-2, rtol=5e-2), max_err

    print("KERNEL_OK")
</pallas_src>

<mosaic_0001>
module attributes {stable_mosaic.version = 11 : i64} {
  func.func private @main(%arg0: i32) attributes {dimension_semantics = [#tpu.dimension_semantics<core_parallel>], iteration_bounds = array<i64: 2>, tpu.core_type = #tpu.core_type<sc_scalar_subcore>, window_params = []} {
    return
  }
}

module attributes {stable_mosaic.version = 11 : i64} {
  func.func private @main(%arg0: i32) attributes {dimension_semantics = [#tpu.dimension_semantics<core_parallel>], iteration_bounds = array<i64: 2>, tpu.core_type = #tpu.core_type<sc_scalar_subcore>, window_params = []} {
    return
  }
}

module attributes {stable_mosaic.version = 11 : i64} {
  func.func @ngcf_fused_kernel(%arg0: i32, %arg1: memref<64x64xbf16, #tpu.memory_space<vmem>>, %arg2: memref<64x32xf32, #tpu.memory_space<vmem>>, %arg3: memref<1x64x32xbf16, #tpu.memory_space<vmem>>, %arg4: memref<1x64x32xf32, #tpu.memory_space<vmem>>, %arg5: memref<64x96xf32, #tpu.memory_space<vmem>>, %arg6: memref<3x64x32xf32, #tpu.memory_space<vmem>>) attributes {dimension_semantics = [#tpu.dimension_semantics<arbitrary>], iteration_bounds = array<i64: 2>, scalar_prefetch = 0 : i64, scratch_operands = 1 : i64, tpu.core_type = #tpu.core_type<tc>, window_params = [{pipeline_mode = #tpu.pipeline_mode<synchronous>, transform_indices = @transform_0, window_bounds = array<i64: 64, 64>}, {pipeline_mode = #tpu.pipeline_mode<synchronous>, transform_indices = @transform_1, window_bounds = array<i64: 64, 32>}, {transform_indices = @transform_2, window_bounds = array<i64: 1, 64, 32>}, {transform_indices = @transform_3, window_bounds = array<i64: 1, 64, 32>}, {pipeline_mode = #tpu.pipeline_mode<synchronous>, transform_indices = @transform_4, window_bounds = array<i64: 64, 96>}]} {
    %c0_i32 = arith.constant 0 : i32
    %0 = arith.cmpi eq, %arg0, %c0_i32 : i32
    %1 = arith.extui %0 : i1 to i32
    %c0_i32_0 = arith.constant 0 : i32
    %2 = arith.cmpi ne, %1, %c0_i32_0 : i32
    scf.if %2 {
      %c0_17 = arith.constant 0 : index
      %c0_18 = arith.constant 0 : index
      %32 = vector.load %arg2[%c0_17, %c0_18] : memref<64x32xf32, #tpu.memory_space<vmem>>, vector<64x32xf32>
      %c0_19 = arith.constant 0 : index
      %c0_20 = arith.constant 0 : index
      %c0_21 = arith.constant 0 : index
      %33 = vector.load %arg6[%c0_19, %c0_20, %c0_21] : memref<3x64x32xf32, #tpu.memory_space<vmem>>, vector<1x64x32xf32>
      %34 = vector.shape_cast %33 : vector<1x64x32xf32> to vector<64x32xf32>
      %35 = vector.shape_cast %32 : vector<64x32xf32> to vector<1x64x32xf32>
      tpu.vector_store %arg6[%c0_19, %c0_20, %c0_21], %35 {strides = array<i32>} : memref<3x64x32xf32, #tpu.memory_space<vmem>>, vector<1x64x32xf32>,
    } else {
    }
    %3 = arith.index_cast %arg0 : i32 to index
    %c0 = arith.constant 0 : index
    %c0_1 = arith.constant 0 : index
    %4 = vector.load %arg6[%3, %c0, %c0_1] : memref<3x64x32xf32, #tpu.memory_space<vmem>>, vector<1x64x32xf32>
    %5 = vector.shape_cast %4 : vector<1x64x32xf32> to vector<64x32xf32>
    %c0_2 = arith.constant 0 : index
    %c0_3 = arith.constant 0 : index
    %6 = vector.load %arg1[%c0_2, %c0_3] : memref<64x64xbf16, #tpu.memory_space<vmem>>, vector<64x64xbf16>
    %7 = arith.truncf %5 : vector<64x32xf32> to vector<64x32xbf16>
    %cst = arith.constant dense<0.000000e+00> : vector<64x32xf32>
    %8 = tpu.matmul %6, %7, %cst {dimension_numbers = #tpu.dot_dimension_numbers<[1], [0], [0], [1], [0, 0, 1, 1], [], []>} : vector<64x64xbf16>, vector<64x32xbf16>, vector<64x32xf32> -> vector<64x32xf32>
    %9 = arith.addf %8, %5 : vector<64x32xf32>
    %10 = arith.mulf %8, %5 : vector<64x32xf32>
    %11 = tpu.concatenate %9, %10 in 1 : vector<64x32xf32>, vector<64x32xf32> -> vector<64x64xf32>
    %12 = arith.truncf %11 : vector<64x64xf32> to vector<64x64xbf16>
    %c0_4 = arith.constant 0 : index
    %c0_5 = arith.constant 0 : index
    %c0_6 = arith.constant 0 : index
    %13 = vector.load %arg3[%c0_4, %c0_5, %c0_6] : memref<1x64x32xbf16, #tpu.memory_space<vmem>>, vector<1x64x32xbf16>
    %14 = vector.shape_cast %13 : vector<1x64x32xbf16> to vector<64x32xbf16>
    %cst_7 = arith.constant dense<0.000000e+00> : vector<64x32xf32>
    %15 = tpu.matmul %12, %14, %cst_7 {dimension_numbers = #tpu.dot_dimension_numbers<[1], [0], [0], [1], [0, 0, 1, 1], [], []>} : vector<64x64xbf16>, vector<64x32xbf16>, vector<64x32xf32> -> vector<64x32xf32>
    %c0_8 = arith.constant 0 : index
    %c0_9 = arith.constant 0 : index
    %c0_10 = arith.constant 0 : index
    %16 = vector.load %arg4[%c0_8, %c0_9, %c0_10] : memref<1x64x32xf32, #tpu.memory_space<vmem>>, vector<1x64x32xf32>
    %17 = vector.shape_cast %16 : vector<1x64x32xf32> to vector<64x32xf32>
    %18 = arith.addf %15, %17 : vector<64x32xf32>
    %cst_11 = arith.constant 0.000000e+00 : f32
    %19 = vector.broadcast %cst_11 : f32 to vector<64x32xf32>
    %20 = arith.cmpf ogt, %18, %19 : vector<64x32xf32>
    %cst_12 = arith.constant 0.00999999977 : f32
    %21 = vector.broadcast %cst_12 : f32 to vector<64x32xf32>
    %22 = arith.mulf %21, %18 : vector<64x32xf32>
    %23 = arith.select %20, %18, %22 : vector<64x32xi1>, vector<64x32xf32>
    %c1_i32 = arith.constant 1 : i32
    %24 = arith.addi %arg0, %c1_i32 : i32
    %25 = arith.index_cast %24 : i32 to index
    %c0_13 = arith.constant 0 : index
    %c0_14 = arith.constant 0 : index
    %26 = vector.load %arg6[%25, %c0_13, %c0_14] : memref<3x64x32xf32, #tpu.memory_space<vmem>>, vector<1x64x32xf32>
    %27 = vector.shape_cast %26 : vector<1x64x32xf32> to vector<64x32xf32>
    %28 = vector.shape_cast %23 : vector<64x32xf32> to vector<1x64x32xf32>
    tpu.vector_store %arg6[%25, %c0_13, %c0_14], %28 {strides = array<i32>} : memref<3x64x32xf32, #tpu.memory_space<vmem>>, vector<1x64x32xf32>,
    %c1_i32_15 = arith.constant 1 : i32
    %29 = arith.cmpi eq, %arg0, %c1_i32_15 : i32
    %30 = arith.extui %29 : i1 to i32
    %c0_i32_16 = arith.constant 0 : i32
    %31 = arith.cmpi ne, %30, %c0_i32_16 : i32
    scf.if %31 {
      %c0_17 = arith.constant 0 : index
      %c0_18 = arith.constant 0 : index
      %c0_19 = arith.constant 0 : index
      %32 = vector.load %arg6[%c0_17, %c0_18, %c0_19] : memref<3x64x32xf32, #tpu.memory_space<vmem>>, vector<1x64x32xf32>
      %33 = vector.shape_cast %32 : vector<1x64x32xf32> to vector<64x32xf32>
      %c1 = arith.constant 1 : index
      %c0_20 = arith.constant 0 : index
      %c0_21 = arith.constant 0 : index
      %34 = vector.load %arg6[%c1, %c0_20, %c0_21] : memref<3x64x32xf32, #tpu.memory_space<vmem>>, vector<1x64x32xf32>
      %35 = vector.shape_cast %34 : vector<1x64x32xf32> to vector<64x32xf32>
      %c2 = arith.constant 2 : index
      %c0_22 = arith.constant 0 : index
      %c0_23 = arith.constant 0 : index
      %36 = vector.load %arg6[%c2, %c0_22, %c0_23] : memref<3x64x32xf32, #tpu.memory_space<vmem>>, vector<1x64x32xf32>
      %37 = vector.shape_cast %36 : vector<1x64x32xf32> to vector<64x32xf32>
      %38 = tpu.concatenate %33, %35, %37 in 1 : vector<64x32xf32>, vector<64x32xf32>, vector<64x32xf32> -> vector<64x96xf32>
      %c0_24 = arith.constant 0 : index
      %c0_25 = arith.constant 0 : index
      %39 = vector.load %arg5[%c0_24, %c0_25] : memref<64x96xf32, #tpu.memory_space<vmem>>, vector<64x96xf32>
      tpu.vector_store %arg5[%c0_24, %c0_25], %38 {strides = array<i32>} : memref<64x96xf32, #tpu.memory_space<vmem>>, vector<64x96xf32>,
    } else {
    }
    return
  }
  func.func @transform_0(%arg0: i32) -> (i32, i32) {
    %c0_i32 = arith.constant 0 : i32
    %c0_i32_0 = arith.constant 0 : i32
    %c0_i32_1 = arith.constant 0 : i32
    return %c0_i32, %c0_i32_0 : i32, i32
  }
  func.func @transform_1(%arg0: i32) -> (i32, i32) {
    %c0_i32 = arith.constant 0 : i32
    %c0_i32_0 = arith.constant 0 : i32
    %c0_i32_1 = arith.constant 0 : i32
    return %c0_i32, %c0_i32_0 : i32, i32
  }
  func.func @transform_2(%arg0: i32) -> (i32, i32, i32) {
    %c0_i32 = arith.constant 0 : i32
    %c0_i32_0 = arith.constant 0 : i32
    %c0_i32_1 = arith.constant 0 : i32
    return %arg0, %c0_i32, %c0_i32_0 : i32, i32, i32
  }
  func.func @transform_3(%arg0: i32) -> (i32, i32, i32) {
    %c0_i32 = arith.constant 0 : i32
    %c0_i32_0 = arith.constant 0 : i32
    %c0_i32_1 = arith.constant 0 : i32
    return %arg0, %c0_i32, %c0_i32_0 : i32, i32, i32
  }
  func.func @transform_4(%arg0: i32) -> (i32, i32) {
    %c0_i32 = arith.constant 0 : i32
    %c0_i32_0 = arith.constant 0 : i32
    %c0_i32_1 = arith.constant 0 : i32
    return %c0_i32, %c0_i32_0 : i32, i32
  }
}

</mosaic_0001>

<bundles_post_ra>
// kernel: mul.15
= control target key start
LH: loop header
LB: loop body
LE: loop exit
PB: predicated region body
PF: predicated region fallthrough
CT: control target
= control target key end

     0   :  { %s34_s0 = inlined_call_operand.vmem [shape: f32[256], index: 0, kind: input, shape index: {}]   ;;  %s35_s1 = inlined_call_operand.vmem [shape: f32[256], index: 1, kind: input, shape index: {}]   ;;  %s36_s2 = inlined_call_operand.vmem [shape: f32[256], index: 2, kind: output, shape index: {}]  }
   0x1   :  { %v3_v0 = vld [vmem:[%s34_s0] sm:$0x3] }
   0x2   :  { %v4_v1 = vld [vmem:[%s35_s1] sm:$0x3] }
   0x3   :  { %v7_v2 = vmul.f32 %v4_v1, %v3_v0 }
   0x5   :  { %9 = vst [vmem:[%s36_s2] sm:$0x3] %v7_v2 }

// kernel: recommender_forward.1
= control target key start
LH: loop header
LB: loop body
LE: loop exit
PB: predicated region body
PF: predicated region fallthrough
CT: control target
= control target key end

     0   :  { %9 = vsyncpa [#allocation4], 0  ;;  %s950_s15 = smov 0   ;;  %s1155_s0 = inlined_call_operand.vmem [shape: bf16[64,64], index: 0, kind: input, shape index: {}]   ;;  %s1156_s1 = inlined_call_operand.vmem [shape: f32[64,32], index: 1, kind: input, shape index: {}]   ;;  %s1157_s2 = inlined_call_operand.vmem [shape: bf16[2,64,32], index: 2, kind: input, shape index: {}]   ;;  %s1158_s3 = inlined_call_operand.vmem [shape: f32[2,64,32], index: 3, kind: input, shape index: {}]   ;;  %s1159_s4 = inlined_call_operand.hbm [shape: f32[64,96], index: 4, kind: output, shape index: {}]  }
   0x1 LB: > { %s956_s16 = sadd.s32 4294967295, %s917_s15   ;;  %p746_p0 = scmp.ge.s32.totalorder %s917_s15, 1  ;;  %s917_s15 = sphi %s950_s15, %s15_s15  }
   0x2   : > { %p168_p1 = scmp.lt.s32.totalorder %s917_s15, 3 }
   0x4   : > { %p169_p2 = pnand %p746_p0, %p168_p1 }
   0x5   : > { %p194_p3 = scmp.lt.s32.totalorder (!%p169_p2), %s956_s16, 1  ;;  %p751_p4 = scmp.ne.s32.totalorder (!%p169_p2), %s956_s16, 0 }
   0x6   : > { %172 = sbr.rel (%p169_p2) target bundleno = 794 (0x31a), region = 36 }
   0xd   : > { %s195_s17 = scalar_select %p194_p3, %s956_s16, 1 }
   0xe   : > { %208 = sbr.rel (%p751_p4) target bundleno = 21 (0x15), region = 40  ;;  %v209_v0 = vld [vmem:[%s1156_s1] sm:$0xff] (!%p751_p4)  ;;  %vm217_vm0 = vcmask (!%p751_p4), 261120   ;;  %v210_v1 = vld [vmem:[%s1156_s1 + $0x8] sm:$0xff] (!%p751_p4)  ;;  %v211_v2 = vld [vmem:[%s1156_s1 + $0x10] sm:$0xff] (!%p751_p4) }
   0xf   : > { %s783_s18 = sshll.u32 %s195_s17, 5  ;;  %s784_s19 = sshll.u32 %s195_s17, 6  ;;  %218 = vst.msk [vmem:[#allocation2] sm:$0xff] (!%p751_p4), %vm217_vm0, %v209_v0  ;;  %219 = vst.msk [vmem:[#allocation2 + $0x8] sm:$0xff] (!%p751_p4), %vm217_vm0, %v210_v1  ;;  %v212_v3 = vld [vmem:[%s1156_s1 + $0x18] sm:$0xff] (!%p751_p4)  ;;  %v213_v4 = vld [vmem:[%s1156_s1 + $0x20] sm:$0xff] (!%p751_p4) }
  0x10   : > { %s965_s22 = scalar_lea.vmem %s1157_s2, %s783_s18  ;;  %s970_s25 = scalar_lea.vmem %s1158_s3, %s784_s19  ;;  %220 = vst.msk [vmem:[#allocation2 + $0x10] sm:$0xff] (!%p751_p4), %vm217_vm0, %v211_v2  ;;  %v214_v5 = vld [vmem:[%s1156_s1 + $0x28] sm:$0xff] (!%p751_p4)  ;;  %221 = vst.msk [vmem:[#allocation2 + $0x18] sm:$0xff] (!%p751_p4), %vm217_vm0, %v212_v3  ;;  %v215_v6 = vld [vmem:[%s1156_s1 + $0x30] sm:$0xff] (!%p751_p4) }
  0x11   : > { %222 = vst.msk [vmem:[#allocation2 + $0x20] sm:$0xff] (!%p751_p4), %vm217_vm0, %v213_v4  ;;  %223 = vst.msk [vmem:[#allocation2 + $0x28] sm:$0xff] (!%p751_p4), %vm217_vm0, %v214_v5  ;;  %v216_v7 = vld [vmem:[%s1156_s1 + $0x38] sm:$0xff] (!%p751_p4) }
  0x12   : > { %224 = vst.msk [vmem:[#allocation2 + $0x30] sm:$0xff] (!%p751_p4), %vm217_vm0, %v215_v6  ;;  %225 = vst.msk [vmem:[#allocation2 + $0x38] sm:$0xff] (!%p751_p4), %vm217_vm0, %v216_v7 }
  0x15 PF: > { %s752_s18 = sshll.u32 %s956_s16, 6  ;;  %v873_v8 = vld [vmem:[%s1155_s0] sm:$0xff]   ;;  %vm268_vm1 = vcmask 523264   ;;  %v874_v21 = vld [vmem:[%s1155_s0 + $0x8] sm:$0xff]   ;;  %v875_v22 = vld [vmem:[%s1155_s0 + $0x10] sm:$0xff]   ;;  %s919_s30 = smov 32  }
  0x16   : > { %s1001_s21 = scalar_lea.vmem [#allocation2], %s752_s18  ;;  %809 = vmatprep.mubr.msk.bf16.mxu0 %vm268_vm1, %v873_v8  ;;  %v876_v23 = vld [vmem:[%s1155_s0 + $0x18] sm:$0xff]   ;;  %v877_v24 = vld [vmem:[%s965_s22] sm:$0xff]   ;;  %v878_v25 = vld [vmem:[%s965_s22 + $0x8] sm:$0xff]   ;;  %vm394_vm2 = vcmask 261120   ;;  %p778_p5 = scmp.ne.s32.totalorder %s956_s16, 1 }
  0x17   : > { %817 = vmatprep.subr.bf16.mxu1 %v877_v24  ;;  %v879_v26 = vld [vmem:[%s965_s22 + $0x10] sm:$0xff]   ;;  %v880_v27 = vld [vmem:[%s965_s22 + $0x18] sm:$0xff]   ;;  %s920_s22 = smov (!%p778_p5), 32   ;;  %vm669_vm11 = vcmask (!%p778_p5), 785408  }
  0x18   : > { %818 = vmatpush3.bf16.msra.mxu1 %v877_v24 }
  0x19   : > { %v1004_v9 = vld [vmem:[%s1001_s21] sm:$0xff]  ;;  %v1007_v10 = vld [vmem:[%s1001_s21 + $0x8] sm:$0xff]  ;;  %v1010_v11 = vld [vmem:[%s1001_s21 + $0x10] sm:$0xff]  ;;  %819 = vmatprep.subr.bf16.mxu1 %v878_v25 }
  0x1a   : > { %v244_v12 = vpack.c.bf16 %v1007_v10, %v1004_v9  ;;  %v1016_v13 = vld [vmem:[%s1001_s21 + $0x18] sm:$0xff]  ;;  %v1021_v15 = vld [vmem:[%s1001_s21 + $0x20] sm:$0xff]  ;;  %v1024_v16 = vld [vmem:[%s1001_s21 + $0x28] sm:$0xff] }
  0x1b   : > { %v245_v14 = vpack.c.bf16 %v1016_v13, %v1010_v11  ;;  %v1027_v17 = vld [vmem:[%s1001_s21 + $0x30] sm:$0xff]  ;;  %v1030_v18 = vld [vmem:[%s1001_s21 + $0x38] sm:$0xff]  ;;  %v246_v19 = vpack.c.bf16 %v1024_v16, %v1021_v15 }
  0x1c   : > { %801 = vmatprep.subr.bf16.mxu0 %v244_v12  ;;  %v247_v20 = vpack.c.bf16 %v1030_v18, %v1027_v17  ;;  %820 = vmatpush3.bf16.msra.mxu1 %v878_v25 }
  0x1d   : > { %802 = vmatpush3.bf16.msra.mxu0 %v244_v12  ;;  %821 = vmatprep.subr.bf16.mxu1 %v879_v26 }
  0x1e   : > { %803 = vmatprep.subr.bf16.mxu0 %v245_v14 }
  0x20   : > { %822 = vmatpush3.bf16.msra.mxu1 %v879_v26 }
  0x21   : > { %804 = vmatpush3.bf16.msra.mxu0 %v245_v14  ;;  %823 = vmatprep.subr.bf16.mxu1 %v880_v27 }
  0x22   : > { %805 = vmatprep.subr.bf16.mxu0 %v246_v19 }
  0x24   : > { %824 = vmatpush3.bf16.msra.mxu1 %v880_v27 }
  0x25   : > { %806 = vmatpush3.bf16.msra.mxu0 %v246_v19  ;;  %v415_v19 = vld [vmem:[%s970_s25] sm:$0xff] }
  0x26   : > { %807 = vmatprep.subr.bf16.mxu0 %v247_v20 }
  0x29   : > { %808 = vmatpush3.bf16.msra.mxu0 %v247_v20 }
  0x2c   : > { %810 = vmatmul.mubr.msk.bf16.vlgmr.msra.gmra.mrb[0].mxu0 %vm268_vm1, %v874_v21  ;;  %v418_v21 = vld [vmem:[%s970_s25 + $0x18] sm:$0xff] }
  0x2d   : > { %813 = vmatprep.mubr.msk.bf16.mxu0 %vm268_vm1, %v875_v22 }
  0x34   : > { %814 = vmatmul.mubr.msk.bf16.gmra.mrb[4].mxu0 %vm268_vm1, %v876_v23  ;;  %v416_v23 = vld [vmem:[%s970_s25 + $0x8] sm:$0xff] }
  0xff   : > { %v811_v28 = vpop.f32.mrb[0].mxu0 }
 0x100   : > { %v315_v29 = vpop.f32.mrb[1].mxu0  ;;  %v356_v31 = vmul.f32 %v811_v28, %v1010_v11  ;;  %v348_v57 = vadd.f32 %v811_v28, %v1010_v11 }
 0x101   : > { %v812_v30 = vpop.f32.mrb[2].mxu0  ;;  %v354_v34 = vmul.f32 %v315_v29, %v1004_v9  ;;  %v346_v49 = vadd.f32 %v315_v29, %v1004_v9 }
 0x102   : > { %v357_v32 = vmul.f32 %v812_v30, %v1016_v13  ;;  %v318_v33 = vpop.f32.mrb[3].mxu0  ;;  %v349_v58 = vadd.f32 %v812_v30, %v1016_v13 }
 0x103   : > { %v355_v35 = vmul.f32 %v318_v33, %v1007_v10  ;;  %v347_v50 = vadd.f32 %v318_v33, %v1007_v10 }
 0x104   : > { %v858_v36 = vpack.i.bf16 %v357_v32, %v356_v31 }
 0x105   : > { %v853_v37 = vpack.i.bf16 %v355_v35, %v354_v34  ;;  %v421_v34 = vld [vmem:[%s970_s25 + $0x30] sm:$0xff] }
 0x107   : > { %854 = vrot.lane.b32.xlu0 %v853_v37, %s919_s30  ;;  %v815_v38 = vpop.f32.mrb[4].mxu0 }
 0x108   : > { %v331_v39 = vpop.f32.mrb[5].mxu0  ;;  %v360_v41 = vmul.f32 %v815_v38, %v1027_v17  ;;  %v352_v9 = vadd.f32 %v815_v38, %v1027_v17 }
 0x109   : > { %v816_v40 = vpop.f32.mrb[6].mxu0  ;;  %v358_v44 = vmul.f32 %v331_v39, %v1021_v15  ;;  %v350_v1 = vadd.f32 %v331_v39, %v1021_v15  ;;  %v422_v39 = vld [vmem:[%s970_s25 + $0x38] sm:$0xff] }
 0x10a   : > { %v361_v42 = vmul.f32 %v816_v40, %v1030_v18  ;;  %v334_v43 = vpop.f32.mrb[7].mxu0  ;;  %v353_v10 = vadd.f32 %v816_v40, %v1030_v18 }
 0x10b   : > { %v359_v45 = vmul.f32 %v334_v43, %v1024_v16  ;;  %859 = vrot.lane.b32.xlu0 %v858_v36, %s919_s30  ;;  %v351_v2 = vadd.f32 %v334_v43, %v1024_v16  ;;  %v417_v16 = vld [vmem:[%s970_s25 + $0x10] sm:$0xff]  ;;  %v419_v36 = vld [vmem:[%s970_s25 + $0x20] sm:$0xff] }
 0x10c   : > { %v868_v46 = vpack.i.bf16 %v361_v42, %v360_v41  ;;  %v420_v42 = vld [vmem:[%s970_s25 + $0x28] sm:$0xff]  ;;  %s921_s25 = smov (!%p778_p5), 64  }
 0x10d   : > { %v863_v47 = vpack.i.bf16 %v359_v45, %v358_v44 }
 0x10f   : > { %864 = vrot.lane.b32.xlu1 %v863_v47, %s919_s30 }
 0x113   : > { %869 = vrot.lane.b32.xlu1 %v868_v46, %s919_s30 }
 0x179   : > { %v855_v48 = vpop.permute.xlu0 %854 }
 0x17a   : > { %v857_v51 = vunpack.i.h.bf16 %v855_v48  ;;  %v856_v52 = vunpack.i.l.bf16 %v855_v48 }
 0x17c   : > { %v395_v53 = vsel %vm394_vm2, %v346_v49, %v856_v52  ;;  %v396_v54 = vsel %vm394_vm2, %v347_v50, %v857_v51 }
 0x17d   : > { %v860_v55 = vpop.permute.xlu0 %859  ;;  %v403_v56 = vpack.c.bf16 %v396_v54, %v395_v53 }
 0x17e   : > { %v862_v59 = vunpack.i.h.bf16 %v860_v55  ;;  %v861_v60 = vunpack.i.l.bf16 %v860_v55 }
 0x17f   : > { %825 = vmatprep.mubr.msk.bf16.mxu1 %vm268_vm1, %v403_v56 }
 0x180   : > { %v398_v61 = vsel %vm394_vm2, %v349_v58, %v862_v59  ;;  %v397_v62 = vsel %vm394_vm2, %v348_v57, %v861_v60 }
 0x181   : > { %v404_v63 = vpack.c.bf16 %v398_v61, %v397_v62  ;;  %v865_v0 = vpop.permute.xlu1 %864 }
 0x182   : > { %v867_v3 = vunpack.i.h.bf16 %v865_v0  ;;  %v866_v4 = vunpack.i.l.bf16 %v865_v0 }
 0x183   : > { %826 = vmatmul.mubr.msk.bf16.vlgmr.msra.gmra.mrb[0].mxu1 %vm268_vm1, %v404_v63 }
 0x184   : > { %v399_v5 = vsel %vm394_vm2, %v350_v1, %v866_v4  ;;  %v400_v6 = vsel %vm394_vm2, %v351_v2, %v867_v3 }
 0x185   : > { %v405_v7 = vpack.c.bf16 %v400_v6, %v399_v5  ;;  %v870_v8 = vpop.permute.xlu1 %869 }
 0x186   : > { %v872_v11 = vunpack.i.h.bf16 %v870_v8  ;;  %v871_v12 = vunpack.i.l.bf16 %v870_v8 }
 0x187   : > { %829 = vmatprep.mubr.msk.bf16.mxu1 %vm268_vm1, %v405_v7 }
 0x188   : > { %v402_v13 = vsel %vm394_vm2, %v353_v10, %v872_v11  ;;  %v401_v14 = vsel %vm394_vm2, %v352_v9, %v871_v12 }
 0x189   : > { %v406_v15 = vpack.c.bf16 %v402_v13, %v401_v14 }
 0x18b   : > { %830 = vmatmul.mubr.msk.bf16.gmra.mrb[4].mxu1 %vm268_vm1, %v406_v15 }
 0x256   : > { %v827_v20 = vpop.f32.mrb[0].mxu1 }
 0x257   : > { %v502_v22 = vadd.f32 %v827_v20, %v417_v16  ;;  %v493_v17 = vpop.f32.mrb[1].mxu1 }
 0x258   : > { %v494_v18 = vadd.f32 %v493_v17, %v415_v19  ;;  %v828_v24 = vpop.f32.mrb[2].mxu1 }
 0x259   : > { %vm526_vm3 = vcmp.gt.f32.partialorder %v502_v22, 0.0  ;;  %v534_v25 = vmul.f32 0.01, %v502_v22  ;;  %v505_v26 = vadd.f32 %v828_v24, %v418_v21  ;;  %v496_v27 = vpop.f32.mrb[3].mxu1 }
 0x25a   : > { %vm524_vm4 = vcmp.gt.f32.partialorder %v494_v18, 0.0  ;;  %v532_v28 = vmul.f32 0.01, %v494_v18  ;;  %v497_v29 = vadd.f32 %v496_v27, %v416_v23 }
 0x25b   : > { %v542_v30 = vsel %vm526_vm3, %v502_v22, %v534_v25  ;;  %vm527_vm5 = vcmp.gt.f32.partialorder %v505_v26, 0.0  ;;  %v535_v31 = vmul.f32 0.01, %v505_v26 }
 0x25c   : > { %772 = vst.msk [vmem:[%s1001_s21 + $0x50] sm:$0xff] %vm394_vm2, %v542_v30  ;;  %v540_v32 = vsel %vm524_vm4, %v494_v18, %v532_v28  ;;  %vm525_vm6 = vcmp.gt.f32.partialorder %v497_v29, 0.0  ;;  %v533_v33 = vmul.f32 0.01, %v497_v29 }
 0x25d   : > { %770 = vst.msk [vmem:[%s1001_s21 + $0x40] sm:$0xff] %vm394_vm2, %v540_v32  ;;  %v543_v35 = vsel %vm527_vm5, %v505_v26, %v535_v31 }
 0x25e   : > { %773 = vst.msk [vmem:[%s1001_s21 + $0x58] sm:$0xff] %vm394_vm2, %v543_v35  ;;  %v541_v37 = vsel %vm525_vm6, %v497_v29, %v533_v33  ;;  %v831_v38 = vpop.f32.mrb[4].mxu1 }
 0x25f   : > { %771 = vst.msk [vmem:[%s1001_s21 + $0x48] sm:$0xff] %vm394_vm2, %v541_v37  ;;  %v518_v40 = vadd.f32 %v831_v38, %v421_v34  ;;  %v509_v41 = vpop.f32.mrb[5].mxu1 }
 0x260   : > { %v510_v43 = vadd.f32 %v509_v41, %v419_v36  ;;  %v832_v44 = vpop.f32.mrb[6].mxu1 }
 0x261   : > { %vm530_vm7 = vcmp.gt.f32.partialorder %v518_v40, 0.0  ;;  %v538_v45 = vmul.f32 0.01, %v518_v40  ;;  %v521_v46 = vadd.f32 %v832_v44, %v422_v39  ;;  %v512_v47 = vpop.f32.mrb[7].mxu1  ;;  %562 = sbr.rel (%p778_p5) target bundleno = 768 (0x300), region = 44 }
 0x262   : > { %vm528_vm8 = vcmp.gt.f32.partialorder %v510_v43, 0.0  ;;  %v536_v48 = vmul.f32 0.01, %v510_v43  ;;  %v513_v49 = vadd.f32 %v512_v47, %v420_v42 }
 0x263   : > { %v546_v50 = vsel %vm530_vm7, %v518_v40, %v538_v45  ;;  %vm531_vm9 = vcmp.gt.f32.partialorder %v521_v46, 0.0  ;;  %v539_v51 = vmul.f32 0.01, %v521_v46 }
 0x264   : > { %776 = vst.msk [vmem:[%s1001_s21 + $0x70] sm:$0xff] %vm394_vm2, %v546_v50  ;;  %v544_v52 = vsel %vm528_vm8, %v510_v43, %v536_v48  ;;  %vm529_vm10 = vcmp.gt.f32.partialorder %v513_v49, 0.0  ;;  %v537_v53 = vmul.f32 0.01, %v513_v49 }
 0x265   : > { %774 = vst.msk [vmem:[%s1001_s21 + $0x60] sm:$0xff] %vm394_vm2, %v544_v52  ;;  %v547_v54 = vsel %vm531_vm9, %v521_v46, %v539_v51 }
 0x266   : > { %777 = vst.msk [vmem:[%s1001_s21 + $0x78] sm:$0xff] %vm394_vm2, %v547_v54  ;;  %v545_v55 = vsel %vm529_vm10, %v513_v49, %v537_v53 }
 0x267   : > { %775 = vst.msk [vmem:[%s1001_s21 + $0x68] sm:$0xff] %vm394_vm2, %v545_v55 }
 0x26e   : > { %v574_v56 = vld [vmem:[#allocation2 + $0x50] sm:$0xff]  ;;  %v572_v57 = vld [vmem:[#allocation2 + $0x40] sm:$0xff]  ;;  %v575_v58 = vld [vmem:[#allocation2 + $0x58] sm:$0xff] }
 0x26f   : > { %601 = vrot.lane.b32.xlu1 %v574_v56, %s920_s22  ;;  %597 = vrot.lane.b32.xlu0 %v572_v57, %s920_s22  ;;  %v573_v59 = vld [vmem:[#allocation2 + $0x48] sm:$0xff]  ;;  %v576_v61 = vld [vmem:[#allocation2 + $0x60] sm:$0xff]  ;;  %v579_v62 = vld [vmem:[#allocation2 + $0x78] sm:$0xff] }
 0x270   : > { %v577_v60 = vld [vmem:[#allocation2 + $0x68] sm:$0xff]  ;;  %v578_v63 = vld [vmem:[#allocation2 + $0x70] sm:$0xff]  ;;  %v581_v1 = vld [vmem:[#allocation2 + $0x80] sm:$0xff] }
 0x271   : > { %v582_v0 = vld [vmem:[#allocation2 + $0x88] sm:$0xff]  ;;  %v584_v2 = vld [vmem:[#allocation2 + $0x98] sm:$0xff]  ;;  %v583_v3 = vld [vmem:[#allocation2 + $0x90] sm:$0xff] }
 0x272   : > { %v586_v4 = vld [vmem:[#allocation2 + $0xa8] sm:$0xff]  ;;  %v585_v5 = vld [vmem:[#allocation2 + $0xa0] sm:$0xff]  ;;  %v588_v6 = vld [vmem:[#allocation2 + $0xb8] sm:$0xff] }
 0x273   : > { %603 = vrot.lane.b32.xlu1 %v575_v58, %s920_s22  ;;  %599 = vrot.lane.b32.xlu0 %v573_v59, %s920_s22  ;;  %v587_v7 = vld [vmem:[#allocation2 + $0xb0] sm:$0xff]  ;;  %v563_v16 = vld [vmem:[#allocation2] sm:$0xff]  ;;  %v564_v19 = vld [vmem:[#allocation2 + $0x8] sm:$0xff] }
 0x274   : > { %v565_v23 = vld [vmem:[#allocation2 + $0x10] sm:$0xff]  ;;  %v566_v18 = vld [vmem:[#allocation2 + $0x18] sm:$0xff]  ;;  %v568_v30 = vld [vmem:[#allocation2 + $0x28] sm:$0xff] }
 0x275   : > { %v567_v31 = vld [vmem:[#allocation2 + $0x20] sm:$0xff]  ;;  %v570_v38 = vld [vmem:[#allocation2 + $0x38] sm:$0xff]  ;;  %v569_v39 = vld [vmem:[#allocation2 + $0x30] sm:$0xff] }
 0x277   : > { %607 = vrot.lane.b32.xlu1 %v577_v60, %s920_s22  ;;  %605 = vrot.lane.b32.xlu0 %v576_v61, %s920_s22 }
 0x27b   : > { %611 = vrot.lane.b32.xlu1 %v579_v62, %s920_s22  ;;  %609 = vrot.lane.b32.xlu0 %v578_v63, %s920_s22 }
 0x27f   : > { %631 = vrot.lane.b32.xlu1 %v582_v0, %s921_s25  ;;  %629 = vrot.lane.b32.xlu0 %v581_v1, %s921_s25 }
 0x283   : > { %635 = vrot.lane.b32.xlu1 %v584_v2, %s921_s25  ;;  %633 = vrot.lane.b32.xlu0 %v583_v3, %s921_s25 }
 0x287   : > { %639 = vrot.lane.b32.xlu1 %v586_v4, %s921_s25  ;;  %637 = vrot.lane.b32.xlu0 %v585_v5, %s921_s25 }
 0x28b   : > { %643 = vrot.lane.b32.xlu1 %v588_v6, %s921_s25  ;;  %641 = vrot.lane.b32.xlu0 %v587_v7, %s921_s25 }
 0x2e1   : > { %v602_v8 = vpop.permute.xlu1 %601  ;;  %v598_v9 = vpop.permute.xlu0 %597 }
 0x2e2   : > { %v653_v20 = vsel %vm394_vm2, %v563_v16, %v598_v9  ;;  %v655_v26 = vsel %vm394_vm2, %v565_v23, %v602_v8 }
 0x2e5   : > { %v604_v10 = vpop.permute.xlu1 %603  ;;  %v600_v11 = vpop.permute.xlu0 %599 }
 0x2e6   : > { %v654_v21 = vsel %vm394_vm2, %v564_v19, %v600_v11  ;;  %v656_v27 = vsel %vm394_vm2, %v566_v18, %v604_v10 }
 0x2e9   : > { %v608_v12 = vpop.permute.xlu1 %607  ;;  %v606_v13 = vpop.permute.xlu0 %605 }
 0x2ea   : > { %v658_v34 = vsel %vm394_vm2, %v568_v30, %v608_v12  ;;  %v657_v35 = vsel %vm394_vm2, %v567_v31, %v606_v13 }
 0x2ed   : > { %v612_v14 = vpop.permute.xlu1 %611  ;;  %v610_v15 = vpop.permute.xlu0 %609 }
 0x2ee   : > { %v660_v42 = vsel %vm394_vm2, %v570_v38, %v612_v14  ;;  %v659_v43 = vsel %vm394_vm2, %v569_v39, %v610_v15 }
 0x2f1   : > { %v632_v22 = vpop.permute.xlu1 %631  ;;  %v630_v17 = vpop.permute.xlu0 %629 }
 0x2f2   : > { %v662_v24 = vsel %vm268_vm1, %v654_v21, %v632_v22  ;;  %v661_v25 = vsel %vm268_vm1, %v653_v20, %v630_v17 }
 0x2f3   : > { %671 = vst.msk [vmem:[#allocation3 + $0x8] sm:$0xff] %vm669_vm11, %v662_v24  ;;  %670 = vst.msk [vmem:[#allocation3] sm:$0xff] %vm669_vm11, %v661_v25 }
 0x2f5   : > { %v636_v28 = vpop.permute.xlu1 %635  ;;  %v634_v29 = vpop.permute.xlu0 %633 }
 0x2f6   : > { %v664_v32 = vsel %vm268_vm1, %v656_v27, %v636_v28  ;;  %v663_v33 = vsel %vm268_vm1, %v655_v26, %v634_v29 }
 0x2f7   : > { %673 = vst.msk [vmem:[#allocation3 + $0x18] sm:$0xff] %vm669_vm11, %v664_v32  ;;  %672 = vst.msk [vmem:[#allocation3 + $0x10] sm:$0xff] %vm669_vm11, %v663_v33 }
 0x2f9   : > { %v640_v36 = vpop.permute.xlu1 %639  ;;  %v638_v37 = vpop.permute.xlu0 %637 }
 0x2fa   : > { %v666_v40 = vsel %vm268_vm1, %v658_v34, %v640_v36  ;;  %v665_v41 = vsel %vm268_vm1, %v657_v35, %v638_v37 }
 0x2fb   : > { %675 = vst.msk [vmem:[#allocation3 + $0x28] sm:$0xff] %vm669_vm11, %v666_v40  ;;  %674 = vst.msk [vmem:[#allocation3 + $0x20] sm:$0xff] %vm669_vm11, %v665_v41 }
 0x2fd   : > { %v644_v44 = vpop.permute.xlu1 %643  ;;  %v642_v45 = vpop.permute.xlu0 %641 }
 0x2fe   : > { %v668_v46 = vsel %vm268_vm1, %v660_v42, %v644_v44  ;;  %v667_v47 = vsel %vm268_vm1, %v659_v43, %v642_v45 }
 0x2ff   : > { %677 = vst.msk [vmem:[#allocation3 + $0x38] sm:$0xff] %vm669_vm11, %v668_v46  ;;  %676 = vst.msk [vmem:[#allocation3 + $0x30] sm:$0xff] %vm669_vm11, %v667_v47 }
 0x300 PF: > { %p837_p6 = scmp.eq.s32.totalorder %s956_s16, 1  ;;  %s922_s5 = smov [#allocation3]  }
 0x301   : > { %s684_s6 = sshll.u32 %s922_s5, 4  ;;  %s685_s6 = int_to_ptr.vmem [resolvable:$true] %s684_s6 }
 0x302   : > { %s881_s7 = scalar_lea.vmem %s685_s6, 1024  ;;  %p888_p10 = scmp.lt.s32.totalorder %s685_s6, %s685_s6 }
 0x303   : > { %p882_p7 = scmp.ne.s32.totalorder %s685_s6, %s881_s7  ;;  %p889_p11 = scmp.lt.s32.totalorder %s881_s7, %s881_s7 }
 0x305   : > { %p883_p8 = pnand %p882_p7, %p837_p6  ;;  %p890_p12 = por %p889_p11, %p888_p10 }
 0x307   : > { %p884_p9 = pneg %p883_p8 }
 0x309   : > { %p891_p13 = pnand %p890_p12, %p884_p9 }
 0x30b   : > { %894 = shalt.err (!%p891_p13)
}
 0x30c   : > { %s895_s10 = scalar_lea.hbm %s1159_s4, 1024 }
 0x30d   : > { %p896_p0 = scmp.ne.s32.totalorder %s1159_s4, %s895_s10  ;;  %p901_p3 = scmp.lt.u32.totalorder %s895_s10, %s1159_s4 }
 0x30f   : > { %p897_p1 = pnand %p896_p0, %p837_p6 }
 0x311   : > { %p898_p2 = pneg %p897_p1 }
 0x313   : > { %p903_p4 = pnand %p901_p3, %p898_p2 }
 0x315   : > { %906 = shalt.err (!%p903_p4)
}
 0x316   : > { %s923_s17 = smov 128   ;;  %s924_s18 = smov 8  }
 0x317   : > { %834 = dma.vmem_to_hbm [thread:$0]  (%p837_p6), %s685_s6, 1024, %s1159_s4, [#allocation4], %s923_s17, %s923_s17, %s924_s18  }
 0x318   : > { %912 = dma.done.wait (%p837_p6), [#allocation4], 1024  }
 0x319   : > { %914 = vsyncadd (%p837_p6), [#allocation4], 4294966272 }
 0x31a PF: > { %s15_s15 = sadd.s32 1, %s917_s15  }
 0x31b   : > { %p12_p5 = scmp.ge.s32.totalorder %s15_s15, 4  }
 0x31d   :  { %14 = sbr.rel (!%p12_p5) target bundleno = 1 (0x1), region = 78 }
 0x324   :  { %700 = vsyncpa [#allocation4], 1 }
 0x325   :  { %702 = vsyncpa [#allocation4 + $0x1], 1 }

</bundles_post_ra>
